<compile_context>
chip_gen: v7x
topology: tpu7x:2x2x1
jax: 0.10.0
libtpu: 0.0.40
codegen_flags: <defaults>
</compile_context>

<pallas_src>
import functools

import jax
import jax.numpy as jnp
from jax.experimental import pallas as pl
from jax.experimental.pallas import tpu as pltpu

LANES = 128
ACC_SUBLANES = 8                       # one f32 vreg is (8, 128)
DEFAULT_MIN_KERNEL_ELEMENTS = 128 * 1024   # below this, fused XLA wins


def _round_up(x, m):
    return (x + m - 1) // m * m


def _sublanes_for_dtype(dtype):
    itemsize = jnp.dtype(dtype).itemsize
    if itemsize >= 4:
        return 8
    if itemsize == 2:
        return 16
    return 32


def _default_max_tile_rows():
    # (4096, 128) f32 = 2 MiB per input block -> ~8 MiB live with double
    # buffering of both inputs; use 1 MiB blocks on v5e (smaller default
    # scoped-VMEM budget, slower HBM means steps are long anyway).
    try:
        kind = jax.devices()[0].device_kind.lower()
    except Exception:
        return 2048
    return 2048 if "v5" in kind else 4096


def _pow_terms(p, one_minus_p, gamma):
    """(1-p)**gamma and p**gamma with cheap paths for gamma==2 / small ints."""
    if gamma == 2.0:
        # Default path: two VPU multiplies, no extra EUP transcendentals.
        return one_minus_p * one_minus_p, p * p
    if float(gamma).is_integer() and 0.0 <= gamma <= 16.0:
        ig = int(gamma)
        return one_minus_p ** ig, p ** ig
    # Fractional gamma: each ** lowers to exp+log on the single EUP port and
    # can become the binding unit; gamma in {2, small ints} is the fast path.
    return one_minus_p ** gamma, p ** gamma


def _loss_expr(t, p, gamma, alpha):
    """Focal-loss expression, identical to the PyTorch module's forward."""
    one_minus_p = 1.0 - p
    omp_g, p_g = _pow_terms(p, one_minus_p, gamma)
    return ((-alpha) * omp_g * t * jnp.log(p + 0.001)
            - (1.0 - alpha) * p_g * (1.0 - t) * jnp.log(one_minus_p + 0.001))


def _focal_sum_kernel(t_ref, p_ref, acc_ref, *, gamma, alpha, tile_rows,
                      last_block_rows):
    """Accumulate the focal-loss sum into a resident (8, 128) f32 block.

    t_ref, p_ref: (tile_rows, 128) input tiles (native dtype, upcast here).
    acc_ref:      (8, 128) f32 output block; its block index is constant across
                  the grid so it stays resident in VMEM and is written back once.
    """
    step = pl.program_id(0)
    nsteps = pl.num_programs(0)

    @pl.when(step == 0)
    def _init():
        acc_ref[...] = jnp.zeros_like(acc_ref)

    t = t_ref[...].astype(jnp.float32)
    p = p_ref[...].astype(jnp.float32)
    loss = _loss_expr(t, p, gamma, alpha)

    def _partial(x):
        # Fold (tile_rows, 128) into one f32 vreg with elementwise vreg adds.
        return x.reshape(tile_rows // ACC_SUBLANES, ACC_SUBLANES, LANES).sum(axis=0)

    if last_block_rows == tile_rows:
        # Every block fully valid: no masking anywhere (static fast path).
        acc_ref[...] += _partial(loss)
    else:
        # Only the last block is ragged; steady-state steps skip the mask.
        @pl.when(step < nsteps - 1)
        def _full():
            acc_ref[...] += _partial(loss)

        @pl.when(step == nsteps - 1)
        def _ragged():
            row_ids = jax.lax.broadcasted_iota(jnp.int32, loss.shape, 0)
            # Keep this a select (jnp.where), NOT a multiply-by-mask:
            # out-of-range rows hold garbage that may be NaN/Inf.
            masked = jnp.where(row_ids < last_block_rows, loss, 0.0)
            acc_ref[...] += _partial(masked)


def bce_focal_loss(target, pt, gamma=2.0, alpha=0.25, reduction="mean", *,
                   min_kernel_elements=DEFAULT_MIN_KERNEL_ELEMENTS,
                   max_tile_rows=None):
    """Pallas implementation of BCEFocalLoss.forward(target, pt).

    Supports reduction in {'mean', 'sum'} (scalar output).
    """
    assert target.shape == pt.shape
    assert reduction in ("mean", "sum")
    # TODO(synk): reduction='none' (elementwise output) not implemented in the kernel.

    n = target.size
    gamma = float(gamma)
    alpha = float(alpha)

    t_flat = jnp.ravel(target)
    p_flat = jnp.ravel(pt)

    n_main = (n // LANES) * LANES
    rows = n_main // LANES

    # Plain-XLA fallback: launch + per-step overhead dominates tiny losses;
    # the streaming kernel only pays off for large element counts.
    if rows == 0 or n < min_kernel_elements:
        total = jnp.sum(_loss_expr(t_flat.astype(jnp.float32),
                                   p_flat.astype(jnp.float32), gamma, alpha))
        return total / jnp.float32(n) if reduction == "mean" else total

    total = jnp.float32(0.0)
    if n_main < n:
        # <128-element tail: reduce in plain JAX (avoids a padded full copy).
        total = total + jnp.sum(_loss_expr(t_flat[n_main:].astype(jnp.float32),
                                           p_flat[n_main:].astype(jnp.float32),
                                           gamma, alpha))

    if max_tile_rows is None:
        max_tile_rows = _default_max_tile_rows()
    # Dtype-aware sublane rounding (8 for f32, 16 for bf16, 32 for int8/fp8).
    sublanes = max(ACC_SUBLANES,
                   _sublanes_for_dtype(target.dtype),
                   _sublanes_for_dtype(pt.dtype))
    max_tile_rows = max(_round_up(max_tile_rows, sublanes), sublanes)
    tile_rows = min(max_tile_rows, _round_up(rows, sublanes))
    num_chunks = -(-rows // tile_rows)
    last_block_rows = rows - (num_chunks - 1) * tile_rows

    t2d = t_flat[:n_main].reshape(rows, LANES)
    p2d = p_flat[:n_main].reshape(rows, LANES)

    in_map = lambda i: (i, 0)
    kernel = functools.partial(
        _focal_sum_kernel, gamma=gamma, alpha=alpha, tile_rows=tile_rows,
        last_block_rows=last_block_rows)

    t_item = jnp.dtype(target.dtype).itemsize
    p_item = jnp.dtype(pt.dtype).itemsize
    cost = pl.CostEstimate(
        flops=14 * n_main,
        transcendentals=2 * n_main,
        bytes_accessed=n_main * (t_item + p_item) + ACC_SUBLANES * LANES * 4)

    # 2 inputs x 2 pipeline buffers x tile + resident accumulator, with headroom.
    vmem_need = (2 * tile_rows * LANES * (t_item + p_item)
                 + 2 * ACC_SUBLANES * LANES * 4)
    vmem_limit = int(min(32 << 20, max(vmem_need * 2, 8 << 20)))

    partial = pl.pallas_call(
        kernel,
        out_shape=jax.ShapeDtypeStruct((ACC_SUBLANES, LANES), jnp.float32),
        grid_spec=pltpu.PrefetchScalarGridSpec(
            num_scalar_prefetch=0,
            grid=(num_chunks,),
            in_specs=[pl.BlockSpec((tile_rows, LANES), in_map),
                      pl.BlockSpec((tile_rows, LANES), in_map)],
            out_specs=pl.BlockSpec((ACC_SUBLANES, LANES), lambda i: (0, 0)),
        ),
        compiler_params=pltpu.CompilerParams(
            dimension_semantics=("arbitrary",),
            vmem_limit_bytes=vmem_limit,
        ),
        cost_estimate=cost,
    )(t2d, p2d)
    # TODO(synk): explicit 2-TensorCore split for v7x (pl.core_map / CORE_PARALLEL
    # with per-core partials); a plain "parallel" size-2 axis does not change
    # codegen and only adds overhead on single-core chips, so it was dropped.

    total = total + jnp.sum(partial)
    if reduction == "mean":
        return total / jnp.float32(n)
    return total


def _reference(target, pt, gamma=2.0, alpha=0.25, reduction="mean"):
    loss = _loss_expr(target.astype(jnp.float32), pt.astype(jnp.float32),
                      gamma, alpha)
    return jnp.mean(loss) if reduction == "mean" else jnp.sum(loss)


if __name__ == "__main__":
    key = jax.random.PRNGKey(0)
    k1, k2, k3, k4 = jax.random.split(key, 4)

    # Small NCHW-shaped inputs consistent with a segmentation-style usage.
    shape = (2, 4, 16, 16)
    pt = jax.random.uniform(k1, shape, dtype=jnp.float32, minval=0.01, maxval=0.99)
    target = (jax.random.uniform(k2, shape, dtype=jnp.float32) > 0.5).astype(jnp.float32)

    # Force the kernel path (min_kernel_elements=0) and a small tile so the
    # multi-step grid + resident accumulator are exercised on a small input.
    loss_mean = jax.block_until_ready(bce_focal_loss(
        target, pt, gamma=2.0, alpha=0.25, reduction="mean",
        min_kernel_elements=0, max_tile_rows=8))
    ref_mean = _reference(target, pt, 2.0, 0.25, "mean")
    assert jnp.allclose(loss_mean, ref_mean, rtol=1e-5, atol=1e-6), (loss_mean, ref_mean)

    loss_sum = jax.block_until_ready(bce_focal_loss(
        target, pt, gamma=2.0, alpha=0.25, reduction="sum", min_kernel_elements=0))
    ref_sum = _reference(target, pt, 2.0, 0.25, "sum")
    assert jnp.allclose(loss_sum, ref_sum, rtol=1e-5, atol=1e-5), (loss_sum, ref_sum)

    # Non-lane-aligned shape: exercises the ragged-row mask and the JAX tail path.
    shape2 = (2, 3, 7, 11)
    pt2 = jax.random.uniform(k3, shape2, dtype=jnp.float32, minval=0.01, maxval=0.99)
    target2 = (jax.random.uniform(k4, shape2, dtype=jnp.float32) > 0.5).astype(jnp.float32)
    loss2 = jax.block_until_ready(bce_focal_loss(
        target2, pt2, gamma=2.0, alpha=0.25, reduction="mean", min_kernel_elements=0))
    ref2 = _reference(target2, pt2, 2.0, 0.25, "mean")
    assert jnp.allclose(loss2, ref2, rtol=1e-5, atol=1e-6), (loss2, ref2)

    # Integer gamma != 2 path through the kernel.
    loss3 = jax.block_until_ready(bce_focal_loss(
        target, pt, gamma=3.0, alpha=0.4, reduction="mean", min_kernel_elements=0))
    ref3 = _reference(target, pt, 3.0, 0.4, "mean")
    assert jnp.allclose(loss3, ref3, rtol=1e-5, atol=1e-6), (loss3, ref3)

    # Default small-input fallback (plain XLA) path.
    loss4 = jax.block_until_ready(bce_focal_loss(target, pt))
    assert jnp.allclose(loss4, ref_mean, rtol=1e-5, atol=1e-6), (loss4, ref_mean)

    print("KERNEL_OK")
</pallas_src>

<mosaic_0001>
module attributes {stable_mosaic.version = 11 : i64} {
  func.func @_focal_sum_kernel(%arg0: i32, %arg1: memref<8x128xf32, #tpu.memory_space<vmem>>, %arg2: memref<8x128xf32, #tpu.memory_space<vmem>>, %arg3: memref<8x128xf32, #tpu.memory_space<vmem>>) attributes {dimension_semantics = [#tpu.dimension_semantics<arbitrary>], iteration_bounds = array<i64: 2>, scalar_prefetch = 0 : i64, scratch_operands = 0 : i64, tpu.core_type = #tpu.core_type<tc>, window_params = [{transform_indices = @transform_0, window_bounds = array<i64: 8, 128>}, {transform_indices = @transform_1, window_bounds = array<i64: 8, 128>}, {pipeline_mode = #tpu.pipeline_mode<synchronous>, transform_indices = @transform_2, window_bounds = array<i64: 8, 128>}]} {
    %c0_i32 = arith.constant 0 : i32
    %0 = arith.cmpi eq, %arg0, %c0_i32 : i32
    %1 = arith.extui %0 : i1 to i32
    %c0_i32_0 = arith.constant 0 : i32
    %2 = arith.cmpi ne, %1, %c0_i32_0 : i32
    scf.if %2 {
      %cst_14 = arith.constant 0.000000e+00 : f32
      %31 = vector.broadcast %cst_14 : f32 to vector<8x128xf32>
      %c0_15 = arith.constant 0 : index
      %c0_16 = arith.constant 0 : index
      %32 = vector.load %arg3[%c0_15, %c0_16] : memref<8x128xf32, #tpu.memory_space<vmem>>, vector<8x128xf32>
      tpu.vector_store %arg3[%c0_15, %c0_16], %31 {strides = array<i32>} : memref<8x128xf32, #tpu.memory_space<vmem>>, vector<8x128xf32>,
    } else {
    }
    %c0 = arith.constant 0 : index
    %c0_1 = arith.constant 0 : index
    %3 = vector.load %arg1[%c0, %c0_1] : memref<8x128xf32, #tpu.memory_space<vmem>>, vector<8x128xf32>
    %c0_2 = arith.constant 0 : index
    %c0_3 = arith.constant 0 : index
    %4 = vector.load %arg2[%c0_2, %c0_3] : memref<8x128xf32, #tpu.memory_space<vmem>>, vector<8x128xf32>
    %cst = arith.constant 1.000000e+00 : f32
    %5 = vector.broadcast %cst : f32 to vector<8x128xf32>
    %6 = arith.subf %5, %4 : vector<8x128xf32>
    %7 = arith.mulf %6, %6 : vector<8x128xf32>
    %8 = arith.mulf %4, %4 : vector<8x128xf32>
    %cst_4 = arith.constant -2.500000e-01 : f32
    %9 = vector.broadcast %cst_4 : f32 to vector<8x128xf32>
    %10 = arith.mulf %9, %7 : vector<8x128xf32>
    %11 = arith.mulf %10, %3 : vector<8x128xf32>
    %cst_5 = arith.constant 1.000000e-03 : f32
    %12 = vector.broadcast %cst_5 : f32 to vector<8x128xf32>
    %13 = arith.addf %4, %12 : vector<8x128xf32>
    %14 = math.log %13 : vector<8x128xf32>
    %15 = arith.mulf %11, %14 : vector<8x128xf32>
    %cst_6 = arith.constant 7.500000e-01 : f32
    %16 = vector.broadcast %cst_6 : f32 to vector<8x128xf32>
    %17 = arith.mulf %16, %8 : vector<8x128xf32>
    %cst_7 = arith.constant 1.000000e+00 : f32
    %18 = vector.broadcast %cst_7 : f32 to vector<8x128xf32>
    %19 = arith.subf %18, %3 : vector<8x128xf32>
    %20 = arith.mulf %17, %19 : vector<8x128xf32>
    %cst_8 = arith.constant 1.000000e-03 : f32
    %21 = vector.broadcast %cst_8 : f32 to vector<8x128xf32>
    %22 = arith.addf %6, %21 : vector<8x128xf32>
    %23 = math.log %22 : vector<8x128xf32>
    %24 = arith.mulf %20, %23 : vector<8x128xf32>
    %25 = arith.subf %15, %24 : vector<8x128xf32>
    %c0_9 = arith.constant 0 : index
    %c0_10 = arith.constant 0 : index
    %26 = vector.load %arg3[%c0_9, %c0_10] : memref<8x128xf32, #tpu.memory_space<vmem>>, vector<8x128xf32>
    %27 = vector.shape_cast %25 : vector<8x128xf32> to vector<1x8x128xf32>
    %cst_11 = arith.constant dense<0.000000e+00> : vector<8x128xf32>
    %28 = vector.multi_reduction <add>, %27, %cst_11 [0] : vector<1x8x128xf32> to vector<8x128xf32>
    %29 = arith.addf %26, %28 : vector<8x128xf32>
    %c0_12 = arith.constant 0 : index
    %c0_13 = arith.constant 0 : index
    %30 = vector.load %arg3[%c0_12, %c0_13] : memref<8x128xf32, #tpu.memory_space<vmem>>, vector<8x128xf32>
    tpu.vector_store %arg3[%c0_12, %c0_13], %29 {strides = array<i32>} : memref<8x128xf32, #tpu.memory_space<vmem>>, vector<8x128xf32>,
    return
  }
  func.func @transform_0(%arg0: i32) -> (i32, i32) {
    %c0_i32 = arith.constant 0 : i32
    %c0_i32_0 = arith.constant 0 : i32
    return %arg0, %c0_i32 : i32, i32
  }
  func.func @transform_1(%arg0: i32) -> (i32, i32) {
    %c0_i32 = arith.constant 0 : i32
    %c0_i32_0 = arith.constant 0 : i32
    return %arg0, %c0_i32 : i32, i32
  }
  func.func @transform_2(%arg0: i32) -> (i32, i32) {
    %c0_i32 = arith.constant 0 : i32
    %c0_i32_0 = arith.constant 0 : i32
    %c0_i32_1 = arith.constant 0 : i32
    return %c0_i32, %c0_i32_0 : i32, i32
  }
}

</mosaic_0001>

<bundles_post_ra>
// kernel: tpu_custom_call.1
= control target key start
LH: loop header
LB: loop body
LE: loop exit
PB: predicated region body
PF: predicated region fallthrough
CT: control target
= control target key end

     0   :  { %7 = vsyncpa [#allocation3], 0  ;;  %s685_s0 = inlined_call_operand.hbm [shape: f32[16,128], index: 0, kind: input, shape index: {}]   ;;  %s686_s1 = inlined_call_operand.hbm [shape: f32[16,128], index: 1, kind: input, shape index: {}]   ;;  %s687_s2 = inlined_call_operand.hbm [shape: f32[8,128], index: 2, kind: output, shape index: {}]  }
   0x1   :  { %9 = vsyncpa [#allocation3 + $0x1], 0 }
   0x2   :  { %10 = vsyncpa [#allocation6], 0 }
   0x3   :  { %12 = vsyncpa [#allocation6 + $0x1], 0 }
   0x4   :  { %13 = vsyncpa [#allocation4], 0  ;;  %s512_s9 = smov 0   ;;  %s514_s10 = smov 0  }
   0x5   :  { %s516_s11 = smov 0   ;;  %s518_s12 = smov 0  }
   0x6 LB: > { %s531_s13 = sadd.s32 4294967295, %s491_s12   ;;  %s534_s14 = sadd.s32 1, %s491_s12   ;;  %s491_s12 = sphi %s518_s12, %s699_s12   ;;  %s487_s11 = sphi %s516_s11, %s698_s11   ;;  %s483_s10 = sphi %s514_s10, %s697_s10   ;;  %s479_s9 = sphi %s512_s9, %s696_s9  }
   0x7   : > { %s23_s15 = ssub.s32 %s491_s12, %s534_s14  ;;  %s26_s16 = sadd.s32 1, %s487_s11 }
   0x8   : > { %p24_p0 = scmp.eq.s32.totalorder %s23_s15, 0  ;;  %p33_p1 = scmp.ne.s32.totalorder %s487_s11, %s483_s10 }
   0x9   : > { %p34_p2 = scmp.eq.s32.totalorder %s491_s12, 0  ;;  %p39_p3 = scmp.ne.s32.totalorder %s483_s10, %s479_s9 }
   0xa   : > { %s544_s17 = scalar_select %p24_p0, %s487_s11, %s26_s16  }
   0xb   : > { %p35_p4 = por %p34_p2, %p33_p1  ;;  %p40_p5 = scmp.eq.s32.totalorder %s531_s13, 0 }
   0xc   : > { %p322_p6 = scmp.lt.s32.totalorder %s491_s12, 2  ;;  %s553_s19 = sand.u32 1, %s487_s11  }
   0xd   : > { %p548_p7 = por %p40_p5, %p39_p3  ;;  %s295_s20 = sshll.u32 %s553_s19, 3 }
   0xe   : > { %s296_s21 = sshll.u32 %s491_s12, 7  ;;  %s114_s25 = scalar_lea.vmem [#allocation2], %s295_s20 }
   0xf   : > { %s689_s18 = scalar_select %p548_p7, 1, 0 }
  0x10   : > { %s562_s24 = scalar_lea.hbm %s685_s0, %s296_s21  ;;  %s121_s26 = sshll.u32 %s114_s25, 4  ;;  %s566_s26 = int_to_ptr.vmem [resolvable:$true] %s121_s26 }
  0x11   : > { %p568_p8 = pnand %p322_p6, %p35_p4  ;;  %s111_s28 = scalar_lea.sflag [#allocation3], %s553_s19 }
  0x12   : > { %s363_s29 = scalar_lea.hbm %s562_s24, 128  ;;  %s368_s4 = scalar_lea.hbm %s685_s0, 256 }
  0x13   : > { %p364_p11 = scmp.ne.s32.totalorder %s562_s24, %s363_s29  ;;  %p365_p12 = pneg %p568_p8 }
  0x14   : > { %p369_p1 = scmp.lt.u32.totalorder %s562_s24, %s685_s0  ;;  %p370_p2 = scmp.lt.u32.totalorder %s368_s4, %s363_s29 }
  0x15   : > { %p366_p13 = pnand %p365_p12, %p364_p11  ;;  %p372_p4 = scmp.lt.u32.totalorder %s363_s29, %s562_s24 }
  0x16   : > { %p371_p3 = por %p370_p2, %p369_p1 }
  0x17   : > { %p367_p0 = pneg %p366_p13 }
  0x18   : > { %p373_p5 = por %p372_p4, %p371_p3 }
  0x1a   : > { %p374_p6 = pnand %p373_p5, %p367_p0 }
  0x1c   : > { %377 = shalt.err (!%p374_p6)
}
  0x1d   : > { %s378_s7 = scalar_lea.vmem %s566_s26, 128  ;;  %s493_s8 = smov [#allocation2]  }
  0x1e   : > { %p379_p11 = scmp.ne.s32.totalorder %s566_s26, %s378_s7  ;;  %s383_s9 = sshll.u32 %s493_s8, 4  ;;  %s384_s9 = int_to_ptr.vmem [resolvable:$false] %s383_s9 }
  0x1f   : > { %s385_s15 = scalar_lea.vmem %s384_s9, 256  ;;  %p386_p10 = scmp.lt.s32.totalorder %s566_s26, %s384_s9 }
  0x20   : > { %p381_p13 = pnand %p379_p11, %p365_p12  ;;  %p387_p1 = scmp.lt.s32.totalorder %s385_s15, %s378_s7 }
  0x22   : > { %p382_p9 = pneg %p381_p13  ;;  %p388_p2 = por %p387_p1, %p386_p10 }
  0x24   : > { %p389_p3 = pnand %p388_p2, %p382_p9 }
  0x26   : > { %392 = shalt.err (!%p389_p3)
}
  0x27   : > { %318 = dma.hbm_to_vmem [thread:$0]  (!%p568_p8), %s562_s24, 128, %s566_s26, %s111_s28  }
  0x28   : > { %p691_p0 = scmp.lt.s32.totalorder %s491_s12, 3  ;;  %p692_p4 = scmp.ge.s32.totalorder %s491_s12, 1 }
  0x29   : > { %s613_s25 = scalar_lea.hbm %s686_s1, %s296_s21  ;;  %s132_s29 = scalar_lea.vmem [#allocation5], %s295_s20 }
  0x2a   : > { %p604_p5 = pnand %p692_p4, %p691_p0  ;;  %s139_s30 = sshll.u32 %s132_s29, 4  ;;  %s140_s30 = int_to_ptr.vmem [resolvable:$true] %s139_s30 }
  0x2b   : > { %s129_s24 = scalar_lea.sflag [#allocation6], %s553_s19  ;;  %s393_s26 = scalar_lea.hbm %s613_s25, 128 }
  0x2c   : > { %s693_s16 = scalar_select %p604_p5, 1, 0 }
  0x2d   : > { %p394_p9 = scmp.ne.s32.totalorder %s613_s25, %s393_s26  ;;  %s398_s21 = scalar_lea.hbm %s686_s1, 256 }
  0x2e   : > { %p399_p11 = scmp.lt.u32.totalorder %s613_s25, %s686_s1  ;;  %p400_p13 = scmp.lt.u32.totalorder %s398_s21, %s393_s26 }
  0x2f   : > { %p396_p10 = pnand %p394_p9, %p365_p12  ;;  %p402_p2 = scmp.lt.u32.totalorder %s393_s26, %s613_s25 }
  0x30   : > { %p401_p1 = por %p400_p13, %p399_p11 }
  0x31   : > { %p397_p6 = pneg %p396_p10 }
  0x32   : > { %p403_p3 = por %p402_p2, %p401_p1 }
  0x34   : > { %p404_p0 = pnand %p403_p3, %p397_p6 }
  0x36   : > { %407 = shalt.err (!%p404_p0)
}
  0x37   : > { %s408_s19 = scalar_lea.vmem %s140_s30, 128  ;;  %s494_s20 = smov [#allocation5]  }
  0x38   : > { %p409_p4 = scmp.ne.s32.totalorder %s140_s30, %s408_s19  ;;  %s413_s5 = sshll.u32 %s494_s20, 4  ;;  %s414_s5 = int_to_ptr.vmem [resolvable:$false] %s413_s5 }
  0x39   : > { %s415_s6 = scalar_lea.vmem %s414_s5, 256  ;;  %p416_p7 = scmp.lt.s32.totalorder %s140_s30, %s414_s5 }
  0x3a   : > { %p411_p9 = pnand %p409_p4, %p365_p12  ;;  %p417_p5 = scmp.lt.s32.totalorder %s415_s6, %s408_s19 }
  0x3c   : > { %p412_p10 = pneg %p411_p9  ;;  %p418_p11 = por %p417_p5, %p416_p7 }
  0x3e   : > { %p419_p13 = pnand %p418_p11, %p412_p10 }
  0x40   : > { %422 = shalt.err (!%p419_p13)
}
  0x41   : > { %321 = dma.hbm_to_vmem [thread:$0]  (!%p568_p8), %s613_s25, 128, %s140_s30, %s129_s24  }
  0x42   : > { %p694_p6 = scmp.ne.s32.totalorder %s693_s16, 0 }
  0x43   : > { %s150_s7 = sand.u32 (!%p694_p6), 1, %s483_s10   ;;  %p695_p12 = scmp.ne.s32.totalorder (!%p694_p6), %s689_s18, 0 }
  0x44   : > { %148 = sbr.rel (%p694_p6) target bundleno = 126 (0x7e), region = 28  ;;  %s300_s8 = sshll.u32 (!%p694_p6), %s150_s7, 3 }
  0x45   : > { %s151_s9 = scalar_lea.sflag (!%p694_p6), [#allocation3], %s150_s7  ;;  %s154_s15 = scalar_lea.vmem (!%p694_p6), [#allocation2], %s300_s8 }
  0x4b   : > { %466 = dma.done.wait (%p695_p12), %s151_s9, 128  }
  0x4c   : > { %468 = vsyncadd (%p695_p12), %s151_s9, 4294967168  ;;  %s160_s22 = scalar_lea.sflag [#allocation6], %s150_s7  ;;  %s163_s23 = scalar_lea.vmem [#allocation5], %s300_s8 }
  0x4d   : > { %470 = dma.done.wait (%p695_p12), %s160_s22, 128  }
  0x4e   : > { %472 = vsyncadd (%p695_p12), %s160_s22, 4294967168  ;;  %p302_p7 = scmp.ne.s32.totalorder %s531_s13, 0 }
  0x4f   : > { %v495_v0 = vmov (!%p302_p7), 0.0  }
  0x50   : > { %187 = sbr.rel (%p302_p7) target bundleno = 87 (0x57), region = 40  ;;  %188 = vst [vmem:[#allocation7] sm:$0xff] (!%p302_p7), %v495_v0 }
  0x57 PF: > { %v190_v1 = vld [vmem:[%s163_s23] sm:$0xff]  ;;  %v189_v7 = vld [vmem:[%s154_s15] sm:$0xff]  ;;  %s496_s18 = smov [#allocation7]   ;;  %p323_p8 = scmp.eq.s32.totalorder %s531_s13, 1 }
  0x58   : > { %v191_v2 = vsub.f32 1.0, %v190_v1  ;;  %v196_v3 = vadd.f32 0.001, %v190_v1  ;;  %v193_v6 = vmul.f32 %v190_v1, %v190_v1  ;;  %v201_v10 = vsub.f32 1.0, %v189_v7  ;;  %v208_v19 = vld [vmem:[#allocation7] sm:$0xff]  ;;  %s219_s27 = sshll.u32 %s496_s18, 4  ;;  %s220_s27 = int_to_ptr.vmem [resolvable:$true] %s219_s27 }
  0x59   : > { %s423_s16 = scalar_lea.vmem %s220_s27, 128  ;;  %p430_p3 = scmp.lt.s32.totalorder %s220_s27, %s220_s27 }
  0x5a   : > { %359 = vlog2.f32 %v196_v3  ;;  %v203_v4 = vadd.f32 0.001, %v191_v2  ;;  %v192_v5 = vmul.f32 %v191_v2, %v191_v2  ;;  %v200_v9 = vmul.f32 0.75, %v193_v6  ;;  %p424_p5 = scmp.ne.s32.totalorder %s220_s27, %s423_s16  ;;  %p431_p0 = scmp.lt.s32.totalorder %s423_s16, %s423_s16 }
  0x5c   : > { %361 = vlog2.f32 %v203_v4  ;;  %v194_v8 = vmul.f32 -0.25, %v192_v5  ;;  %v202_v14 = vmul.f32 %v201_v10, %v200_v9  ;;  %p425_p1 = pnand %p424_p5, %p323_p8  ;;  %p432_p4 = por %p431_p0, %p430_p3 }
  0x5e   : > { %v195_v11 = vmul.f32 %v194_v8, %v189_v7  ;;  %p426_p2 = pneg %p425_p1 }
  0x60   : > { %p433_p9 = pnand %p432_p4, %p426_p2 }
  0x64   : > { %v360_v12 = vpop.eup %359 }
  0x65   : > { %v198_v13 = vmul.f32 0.6931472, %v360_v12 }
  0x66   : > { %v362_v15 = vpop.eup %361 }
  0x67   : > { %v199_v16 = vmul.f32 %v198_v13, %v195_v11  ;;  %v205_v17 = vmul.f32 0.6931472, %v362_v15 }
  0x69   : > { %v206_v18 = vmul.f32 %v205_v17, %v202_v14 }
  0x6b   : > { %v207_v20 = vsub.f32 %v199_v16, %v206_v18 }
  0x6d   : > { %v210_v21 = vadd.f32 %v208_v19, %v207_v20 }
  0x6f   : > { %211 = vst [vmem:[#allocation7] sm:$0xff] %v210_v21 }
  0x70   : > { %436 = shalt.err (!%p433_p9)
}
  0x71   : > { %s437_s30 = scalar_lea.hbm %s687_s2, 128 }
  0x72   : > { %p438_p10 = scmp.ne.s32.totalorder %s687_s2, %s437_s30  ;;  %p443_p6 = scmp.lt.u32.totalorder %s437_s30, %s687_s2 }
  0x74   : > { %p439_p11 = pnand %p438_p10, %p323_p8 }
  0x76   : > { %p440_p13 = pneg %p439_p11 }
  0x78   : > { %p445_p12 = pnand %p443_p6, %p440_p13 }
  0x7a   : > { %448 = shalt.err (!%p445_p12)
}
  0x7b   : > { %312 = dma.vmem_to_hbm [thread:$0]  (%p323_p8), %s220_s27, 128, %s687_s2, [#allocation4]  }
  0x7c   : > { %474 = dma.done.wait (%p323_p8), [#allocation4], 128  }
  0x7d   : > { %476 = vsyncadd (%p323_p8), [#allocation4], 4294967168 }
  0x7e PF: > { %p16_p7 = scmp.ge.s32.totalorder %s534_s14, 4   ;;  %s696_s9 = smov %s483_s10 }
  0x7f   : > { %s697_s10 = smov %s487_s11  ;;  %s698_s11 = smov %s544_s17 }
  0x80   : > { %s699_s12 = smov %s534_s14  ;;  %18 = sbr.rel (!%p16_p7) target bundleno = 6 (0x6), region = 82 }
  0x87   :  { %232 = vsyncpa [#allocation3], 1 }
  0x88   :  { %234 = vsyncpa [#allocation3 + $0x1], 1 }
  0x89   :  { %235 = vsyncpa [#allocation6], 1 }
  0x8a   :  { %237 = vsyncpa [#allocation6 + $0x1], 1 }
  0x8b   :  { %238 = vsyncpa [#allocation4], 1 }
  0x8c   :  { %240 = vsyncpa [#allocation4 + $0x1], 1 }

</bundles_post_ra>
